<compile_context>
chip_gen: v6e
topology: v6e:2x2x1
jax: 0.10.0
libtpu: 0.0.40
codegen_flags: <defaults>
</compile_context>

<pallas_src>
from functools import partial

import jax
import jax.numpy as jnp
from jax.experimental import pallas as pl
from jax.experimental.pallas import tpu as pltpu


def residual_block_kernel(H, W, x_ref, w_ref, b_ref, out_ref, xpf_ref, col_ref):
    # x_ref  : (1, C, H*W)             flattened NCHW input (also the shortcut)
    # w_ref  : (C, 9*C)                weight; column index = (kh*3 + kw)*C + cin
    # b_ref  : (C, 1)                  conv bias
    # out_ref: (1, C, H*W)
    # xpf_ref: VMEM (C, H*W + 2*(W+1)) zero-padded flat image
    # col_ref: VMEM (9*C, H*W)         im2col^T staging buffer
    C = x_ref.shape[1]
    HW = H * W
    PAD = W + 1

    x = x_ref[0]                                     # (C, HW) lane-dense load

    # Zero-padded flat image: shifting the flat index p by dh*W + dw reads
    # zeros whenever h+dh falls outside [0, H).  Re-zero every step: with
    # megacore sharding each core owns its own scratch instance, so a
    # "zero only on step 0" guard would be wrong.
    xpf_ref[...] = jnp.zeros_like(xpf_ref)
    xpf_ref[:, PAD:PAD + HW] = x

    # Lane-position masks for the only remaining wrap case: w-1 at w==0 and
    # w+1 at w==W-1 would otherwise read the neighbouring row's pixel.
    w_idx = jax.lax.broadcasted_iota(jnp.int32, (C, HW), 1) % W
    keep = {-1: w_idx >= 1, 0: None, 1: w_idx <= W - 2}

    # im2col^T staging: col[(kh*3+kw)*C + cin, p] = x_padded[cin, h+kh-1, w+kw-1].
    # Each tap is a static lane-slice of the flat padded scratch.
    for kh in range(3):
        for kw in range(3):
            t = kh * 3 + kw
            dp = (kh - 1) * W + (kw - 1)             # flat-index shift of this tap
            win = xpf_ref[:, PAD + dp:PAD + dp + HW]  # (C, HW)
            mask = keep[kw - 1]
            if mask is not None:
                win = jnp.where(mask, win, jnp.zeros_like(win))
            col_ref[t * C:(t + 1) * C, :] = win

    # One fat MXU matmul with contraction K = 9*C, output width H*W (lane-dense).
    acc = jnp.dot(w_ref[...], col_ref[...], preferred_element_type=jnp.float32)
    acc = acc + b_ref[...].astype(jnp.float32)       # conv bias (broadcast over lanes)
    acc = acc + x.astype(jnp.float32)                 # identity shortcut
    out_ref[0] = jnp.maximum(acc, 0.0).astype(out_ref.dtype)  # post_act = ReLU


def residual_block(x_nchw, w_oihw, b):
    """out = relu(conv3x3(x) + b + x).  x_nchw: (N,C,H,W); w_oihw: (C,C,3,3); b: (C,)"""
    N, C, H, W = x_nchw.shape
    HW = H * W

    x_flat = x_nchw.reshape(N, C, HW)                 # free: same memory layout
    # OIHW -> (O, KH, KW, I) -> (C, 9*C); column index = (kh*3 + kw)*C + cin,
    # matching the row layout of the in-kernel im2col^T staging.
    w_mat = jnp.transpose(w_oihw, (0, 2, 3, 1)).reshape(C, 9 * C)
    b_col = b.reshape(C, 1)

    flops = 2 * N * HW * 9 * C * C
    bytes_accessed = x_flat.dtype.itemsize * (2 * N * HW * C + 9 * C * C + C)
    cost = pl.CostEstimate(flops=flops, transcendentals=0,
                           bytes_accessed=bytes_accessed)

    itemsize = x_flat.dtype.itemsize
    vmem_est = itemsize * (
        2 * C * HW                  # input block (double-buffered)
        + 2 * C * HW                # output block (double-buffered)
        + 2 * (9 * C * C + C)       # weights + bias
        + C * (HW + 2 * (W + 1))    # padded flat scratch
        + 9 * C * HW)               # im2col^T scratch
    vmem_limit = int(min(64 * 2**20, max(16 * 2**20, 4 * vmem_est)))

    out_flat = pl.pallas_call(
        partial(residual_block_kernel, H, W),
        out_shape=jax.ShapeDtypeStruct((N, C, HW), x_flat.dtype),
        grid=(N,),
        in_specs=[
            pl.BlockSpec((1, C, HW), lambda n: (n, 0, 0)),
            pl.BlockSpec((C, 9 * C), lambda n: (0, 0)),
            pl.BlockSpec((C, 1), lambda n: (0, 0)),
        ],
        out_specs=pl.BlockSpec((1, C, HW), lambda n: (n, 0, 0)),
        scratch_shapes=[
            pltpu.VMEM((C, HW + 2 * (W + 1)), x_flat.dtype),
            pltpu.VMEM((9 * C, HW), x_flat.dtype),
        ],
        compiler_params=pltpu.CompilerParams(
            dimension_semantics=("parallel",),
            vmem_limit_bytes=vmem_limit),
        cost_estimate=cost,
    )(x_flat, w_mat, b_col)

    return out_flat.reshape(N, C, H, W)               # free: same memory layout


def _reference(x_nchw, w_oihw, b):
    conv = jax.lax.conv_general_dilated(
        x_nchw, w_oihw, window_strides=(1, 1), padding="SAME",
        dimension_numbers=("NCHW", "OIHW", "NCHW"))
    return jnp.maximum(conv + b[None, :, None, None] + x_nchw, 0.0)


if __name__ == "__main__":
    N, C, H, W = 2, 4, 16, 16
    key = jax.random.PRNGKey(0)
    kx, kw_, kb = jax.random.split(key, 3)
    x = jax.random.normal(kx, (N, C, H, W), dtype=jnp.float32)
    # Deterministic synthetic parameters (Conv2d(C, C, 3, padding=1) shapes).
    fan_in = C * 3 * 3
    bound = 1.0 / (fan_in ** 0.5)
    w = jax.random.uniform(kw_, (C, C, 3, 3), jnp.float32, -bound, bound)
    b = jax.random.uniform(kb, (C,), jnp.float32, -bound, bound)

    out = jax.block_until_ready(residual_block(x, w, b))

    ref = _reference(x, w, b)
    assert out.shape == (N, C, H, W)
    assert jnp.allclose(out, ref, atol=1e-4, rtol=1e-4), "mismatch vs reference"
    print("KERNEL_OK")
</pallas_src>

<mosaic_0001>
module attributes {stable_mosaic.version = 11 : i64} {
  func.func @residual_block_kernel(%arg0: i32, %arg1: memref<1x4x256xf32, #tpu.memory_space<vmem>>, %arg2: memref<4x36xf32, #tpu.memory_space<vmem>>, %arg3: memref<4x1xf32, #tpu.memory_space<vmem>>, %arg4: memref<1x4x256xf32, #tpu.memory_space<vmem>>, %arg5: memref<4x290xf32, #tpu.memory_space<vmem>>, %arg6: memref<36x256xf32, #tpu.memory_space<vmem>>) attributes {dimension_semantics = [#tpu.dimension_semantics<parallel>], iteration_bounds = array<i64: 2>, scalar_prefetch = 0 : i64, scratch_operands = 2 : i64, tpu.core_type = #tpu.core_type<tc>, window_params = [{transform_indices = @transform_0, window_bounds = array<i64: 1, 4, 256>}, {pipeline_mode = #tpu.pipeline_mode<synchronous>, transform_indices = @transform_1, window_bounds = array<i64: 4, 36>}, {pipeline_mode = #tpu.pipeline_mode<synchronous>, transform_indices = @transform_2, window_bounds = array<i64: 4, 1>}, {transform_indices = @transform_3, window_bounds = array<i64: 1, 4, 256>}]} {
    %c0 = arith.constant 0 : index
    %c0_0 = arith.constant 0 : index
    %c0_1 = arith.constant 0 : index
    %0 = vector.load %arg1[%c0, %c0_0, %c0_1] : memref<1x4x256xf32, #tpu.memory_space<vmem>>, vector<1x4x256xf32>
    %1 = vector.shape_cast %0 : vector<1x4x256xf32> to vector<4x256xf32>
    %cst = arith.constant 0.000000e+00 : f32
    %2 = vector.broadcast %cst : f32 to vector<4x290xf32>
    %c0_2 = arith.constant 0 : index
    %c0_3 = arith.constant 0 : index
    %3 = vector.load %arg5[%c0_2, %c0_3] : memref<4x290xf32, #tpu.memory_space<vmem>>, vector<4x290xf32>
    tpu.vector_store %arg5[%c0_2, %c0_3], %2 {strides = array<i32>} : memref<4x290xf32, #tpu.memory_space<vmem>>, vector<4x290xf32>,
    %c0_4 = arith.constant 0 : index
    %c17 = arith.constant 17 : index
    %4 = vector.load %arg5[%c0_4, %c17] : memref<4x290xf32, #tpu.memory_space<vmem>>, vector<4x256xf32>
    tpu.vector_store %arg5[%c0_4, %c17], %1 {strides = array<i32>} : memref<4x290xf32, #tpu.memory_space<vmem>>, vector<4x256xf32>,
    %5 = tpu.iota {dimensions = array<i32: 1>} : vector<4x256xi32>
    %c16_i32 = arith.constant 16 : i32
    %c0_i32 = arith.constant 0 : i32
    %6 = arith.cmpi eq, %c16_i32, %c0_i32 : i32
    %c1_i32 = arith.constant 1 : i32
    %7 = arith.select %6, %c1_i32, %c16_i32 : i32
    %8 = vector.broadcast %7 : i32 to vector<4x256xi32>
    %9 = arith.remsi %5, %8 : vector<4x256xi32>
    %c0_i32_5 = arith.constant 0 : i32
    %10 = vector.broadcast %c0_i32_5 : i32 to vector<4x256xi32>
    %11 = arith.cmpi ne, %9, %10 : vector<4x256xi32>
    %c0_i32_6 = arith.constant 0 : i32
    %12 = vector.broadcast %c0_i32_6 : i32 to vector<4x256xi32>
    %13 = arith.cmpi slt, %9, %12 : vector<4x256xi32>
    %c0_i32_7 = arith.constant 0 : i32
    %14 = arith.cmpi slt, %7, %c0_i32_7 : i32
    %15 = vector.broadcast %14 : i1 to vector<4x256xi1>
    %16 = vector.broadcast %15 : vector<4x256xi1> to vector<4x256xi1>
    %17 = arith.xori %13, %16 : vector<4x256xi1>
    %18 = arith.andi %17, %11 : vector<4x256xi1>
    %19 = vector.broadcast %7 : i32 to vector<4x256xi32>
    %20 = arith.addi %9, %19 : vector<4x256xi32>
    %21 = arith.select %18, %20, %9 : vector<4x256xi1>, vector<4x256xi32>
    %c1_i32_8 = arith.constant 1 : i32
    %22 = vector.broadcast %c1_i32_8 : i32 to vector<4x256xi32>
    %23 = arith.cmpi sge, %21, %22 : vector<4x256xi32>
    %c14_i32 = arith.constant 14 : i32
    %24 = vector.broadcast %c14_i32 : i32 to vector<4x256xi32>
    %25 = arith.cmpi sle, %21, %24 : vector<4x256xi32>
    %c0_9 = arith.constant 0 : index
    %c0_10 = arith.constant 0 : index
    %26 = vector.load %arg5[%c0_9, %c0_10] : memref<4x290xf32, #tpu.memory_space<vmem>>, vector<4x256xf32>
    %cst_11 = arith.constant 0.000000e+00 : f32
    %27 = vector.broadcast %cst_11 : f32 to vector<4x256xf32>
    %28 = arith.select %23, %26, %27 : vector<4x256xi1>, vector<4x256xf32>
    %c0_12 = arith.constant 0 : index
    %c0_13 = arith.constant 0 : index
    %29 = vector.load %arg6[%c0_12, %c0_13] : memref<36x256xf32, #tpu.memory_space<vmem>>, vector<4x256xf32>
    tpu.vector_store %arg6[%c0_12, %c0_13], %28 {strides = array<i32>} : memref<36x256xf32, #tpu.memory_space<vmem>>, vector<4x256xf32>,
    %c0_14 = arith.constant 0 : index
    %c1 = arith.constant 1 : index
    %30 = vector.load %arg5[%c0_14, %c1] : memref<4x290xf32, #tpu.memory_space<vmem>>, vector<4x256xf32>
    %c4 = arith.constant 4 : index
    %c0_15 = arith.constant 0 : index
    %31 = vector.load %arg6[%c4, %c0_15] : memref<36x256xf32, #tpu.memory_space<vmem>>, vector<4x256xf32>
    tpu.vector_store %arg6[%c4, %c0_15], %30 {strides = array<i32>} : memref<36x256xf32, #tpu.memory_space<vmem>>, vector<4x256xf32>,
    %c0_16 = arith.constant 0 : index
    %c2 = arith.constant 2 : index
    %32 = vector.load %arg5[%c0_16, %c2] : memref<4x290xf32, #tpu.memory_space<vmem>>, vector<4x256xf32>
    %cst_17 = arith.constant 0.000000e+00 : f32
    %33 = vector.broadcast %cst_17 : f32 to vector<4x256xf32>
    %34 = arith.select %25, %32, %33 : vector<4x256xi1>, vector<4x256xf32>
    %c8 = arith.constant 8 : index
    %c0_18 = arith.constant 0 : index
    %35 = vector.load %arg6[%c8, %c0_18] : memref<36x256xf32, #tpu.memory_space<vmem>>, vector<4x256xf32>
    tpu.vector_store %arg6[%c8, %c0_18], %34 {strides = array<i32>} : memref<36x256xf32, #tpu.memory_space<vmem>>, vector<4x256xf32>,
    %c0_19 = arith.constant 0 : index
    %c16 = arith.constant 16 : index
    %36 = vector.load %arg5[%c0_19, %c16] : memref<4x290xf32, #tpu.memory_space<vmem>>, vector<4x256xf32>
    %cst_20 = arith.constant 0.000000e+00 : f32
    %37 = vector.broadcast %cst_20 : f32 to vector<4x256xf32>
    %38 = arith.select %23, %36, %37 : vector<4x256xi1>, vector<4x256xf32>
    %c12 = arith.constant 12 : index
    %c0_21 = arith.constant 0 : index
    %39 = vector.load %arg6[%c12, %c0_21] : memref<36x256xf32, #tpu.memory_space<vmem>>, vector<4x256xf32>
    tpu.vector_store %arg6[%c12, %c0_21], %38 {strides = array<i32>} : memref<36x256xf32, #tpu.memory_space<vmem>>, vector<4x256xf32>,
    %c0_22 = arith.constant 0 : index
    %c17_23 = arith.constant 17 : index
    %40 = vector.load %arg5[%c0_22, %c17_23] : memref<4x290xf32, #tpu.memory_space<vmem>>, vector<4x256xf32>
    %c16_24 = arith.constant 16 : index
    %c0_25 = arith.constant 0 : index
    %41 = vector.load %arg6[%c16_24, %c0_25] : memref<36x256xf32, #tpu.memory_space<vmem>>, vector<4x256xf32>
    tpu.vector_store %arg6[%c16_24, %c0_25], %40 {strides = array<i32>} : memref<36x256xf32, #tpu.memory_space<vmem>>, vector<4x256xf32>,
    %c0_26 = arith.constant 0 : index
    %c18 = arith.constant 18 : index
    %42 = vector.load %arg5[%c0_26, %c18] : memref<4x290xf32, #tpu.memory_space<vmem>>, vector<4x256xf32>
    %cst_27 = arith.constant 0.000000e+00 : f32
    %43 = vector.broadcast %cst_27 : f32 to vector<4x256xf32>
    %44 = arith.select %25, %42, %43 : vector<4x256xi1>, vector<4x256xf32>
    %c20 = arith.constant 20 : index
    %c0_28 = arith.constant 0 : index
    %45 = vector.load %arg6[%c20, %c0_28] : memref<36x256xf32, #tpu.memory_space<vmem>>, vector<4x256xf32>
    tpu.vector_store %arg6[%c20, %c0_28], %44 {strides = array<i32>} : memref<36x256xf32, #tpu.memory_space<vmem>>, vector<4x256xf32>,
    %c0_29 = arith.constant 0 : index
    %c32 = arith.constant 32 : index
    %46 = vector.load %arg5[%c0_29, %c32] : memref<4x290xf32, #tpu.memory_space<vmem>>, vector<4x256xf32>
    %cst_30 = arith.constant 0.000000e+00 : f32
    %47 = vector.broadcast %cst_30 : f32 to vector<4x256xf32>
    %48 = arith.select %23, %46, %47 : vector<4x256xi1>, vector<4x256xf32>
    %c24 = arith.constant 24 : index
    %c0_31 = arith.constant 0 : index
    %49 = vector.load %arg6[%c24, %c0_31] : memref<36x256xf32, #tpu.memory_space<vmem>>, vector<4x256xf32>
    tpu.vector_store %arg6[%c24, %c0_31], %48 {strides = array<i32>} : memref<36x256xf32, #tpu.memory_space<vmem>>, vector<4x256xf32>,
    %c0_32 = arith.constant 0 : index
    %c33 = arith.constant 33 : index
    %50 = vector.load %arg5[%c0_32, %c33] : memref<4x290xf32, #tpu.memory_space<vmem>>, vector<4x256xf32>
    %c28 = arith.constant 28 : index
    %c0_33 = arith.constant 0 : index
    %51 = vector.load %arg6[%c28, %c0_33] : memref<36x256xf32, #tpu.memory_space<vmem>>, vector<4x256xf32>
    tpu.vector_store %arg6[%c28, %c0_33], %50 {strides = array<i32>} : memref<36x256xf32, #tpu.memory_space<vmem>>, vector<4x256xf32>,
    %c0_34 = arith.constant 0 : index
    %c34 = arith.constant 34 : index
    %52 = vector.load %arg5[%c0_34, %c34] : memref<4x290xf32, #tpu.memory_space<vmem>>, vector<4x256xf32>
    %cst_35 = arith.constant 0.000000e+00 : f32
    %53 = vector.broadcast %cst_35 : f32 to vector<4x256xf32>
    %54 = arith.select %25, %52, %53 : vector<4x256xi1>, vector<4x256xf32>
    %c32_36 = arith.constant 32 : index
    %c0_37 = arith.constant 0 : index
    %55 = vector.load %arg6[%c32_36, %c0_37] : memref<36x256xf32, #tpu.memory_space<vmem>>, vector<4x256xf32>
    tpu.vector_store %arg6[%c32_36, %c0_37], %54 {strides = array<i32>} : memref<36x256xf32, #tpu.memory_space<vmem>>, vector<4x256xf32>,
    %c0_38 = arith.constant 0 : index
    %c0_39 = arith.constant 0 : index
    %56 = vector.load %arg2[%c0_38, %c0_39] : memref<4x36xf32, #tpu.memory_space<vmem>>, vector<4x36xf32>
    %c0_40 = arith.constant 0 : index
    %c0_41 = arith.constant 0 : index
    %57 = vector.load %arg6[%c0_40, %c0_41] : memref<36x256xf32, #tpu.memory_space<vmem>>, vector<36x256xf32>
    %cst_42 = arith.constant dense<0.000000e+00> : vector<4x256xf32>
    %58 = tpu.matmul %56, %57, %cst_42 {dimension_numbers = #tpu.dot_dimension_numbers<[1], [0], [0], [1], [0, 0, 1, 1], [], []>} : vector<4x36xf32>, vector<36x256xf32>, vector<4x256xf32> -> vector<4x256xf32>
    %c0_43 = arith.constant 0 : index
    %c0_44 = arith.constant 0 : index
    %59 = vector.load %arg3[%c0_43, %c0_44] : memref<4x1xf32, #tpu.memory_space<vmem>>, vector<4x1xf32>
    %60 = vector.broadcast %59 : vector<4x1xf32> to vector<4x256xf32>
    %61 = arith.addf %58, %60 : vector<4x256xf32>
    %62 = arith.addf %61, %1 : vector<4x256xf32>
    %cst_45 = arith.constant 0.000000e+00 : f32
    %63 = vector.broadcast %cst_45 : f32 to vector<4x256xf32>
    %64 = arith.maximumf %62, %63 : vector<4x256xf32>
    %c0_46 = arith.constant 0 : index
    %c0_47 = arith.constant 0 : index
    %c0_48 = arith.constant 0 : index
    %65 = vector.load %arg4[%c0_46, %c0_47, %c0_48] : memref<1x4x256xf32, #tpu.memory_space<vmem>>, vector<1x4x256xf32>
    %66 = vector.shape_cast %65 : vector<1x4x256xf32> to vector<4x256xf32>
    %67 = vector.shape_cast %64 : vector<4x256xf32> to vector<1x4x256xf32>
    tpu.vector_store %arg4[%c0_46, %c0_47, %c0_48], %67 {strides = array<i32>} : memref<1x4x256xf32, #tpu.memory_space<vmem>>, vector<1x4x256xf32>,
    return
  }
  func.func @transform_0(%arg0: i32) -> (i32, i32, i32) {
    %c0_i32 = arith.constant 0 : i32
    %c0_i32_0 = arith.constant 0 : i32
    %c0_i32_1 = arith.constant 0 : i32
    return %arg0, %c0_i32, %c0_i32_0 : i32, i32, i32
  }
  func.func @transform_1(%arg0: i32) -> (i32, i32) {
    %c0_i32 = arith.constant 0 : i32
    %c0_i32_0 = arith.constant 0 : i32
    %c0_i32_1 = arith.constant 0 : i32
    return %c0_i32, %c0_i32_0 : i32, i32
  }
  func.func @transform_2(%arg0: i32) -> (i32, i32) {
    %c0_i32 = arith.constant 0 : i32
    %c0_i32_0 = arith.constant 0 : i32
    %c0_i32_1 = arith.constant 0 : i32
    return %c0_i32, %c0_i32_0 : i32, i32
  }
  func.func @transform_3(%arg0: i32) -> (i32, i32, i32) {
    %c0_i32 = arith.constant 0 : i32
    %c0_i32_0 = arith.constant 0 : i32
    %c0_i32_1 = arith.constant 0 : i32
    return %arg0, %c0_i32, %c0_i32_0 : i32, i32, i32
  }
}

</mosaic_0001>

<bundles_post_ra>
// kernel: tpu_custom_call.1
= control target key start
LH: loop header
LB: loop body
LE: loop exit
PB: predicated region body
PF: predicated region fallthrough
CT: control target
= control target key end

     0   :  { %8 = vsyncpa [#allocation5], 0  ;;  %s1042_s0 = inlined_call_operand.hbm [shape: f32[2,4,256], index: 0, kind: input, shape index: {}]   ;;  %s1043_s1 = inlined_call_operand.vmem [shape: f32[4,36], index: 1, kind: input, shape index: {}]   ;;  %s1044_s2 = inlined_call_operand.vmem [shape: f32[4,1], index: 2, kind: input, shape index: {}]   ;;  %s1045_s3 = inlined_call_operand.hbm [shape: f32[2,4,256], index: 3, kind: output, shape index: {}]  }
   0x1   :  { %10 = vsyncpa [#allocation5 + $0x1], 0 }
   0x2   :  { %11 = vsyncpa [#allocation6], 0 }
   0x3   :  { %13 = vsyncpa [#allocation6 + $0x1], 0  ;;  %s817_s12 = smov 0   ;;  %s819_s13 = smov 0  }
   0x4   :  { %s821_s14 = smov 0   ;;  %s823_s15 = smov 0  }
   0x5 LB: > { %s838_s16 = sadd.s32 4294967295, %s782_s15   ;;  %s607_s17 = sadd.s32 4294967294, %s782_s15   ;;  %s782_s15 = sphi %s823_s15, %s1070_s15   ;;  %s778_s14 = sphi %s821_s14, %s1069_s14   ;;  %s774_s13 = sphi %s819_s13, %s1068_s13   ;;  %s770_s12 = sphi %s817_s12, %s1067_s12  }
   0x6   : > { %s842_s18 = sadd.s32 1, %s782_s15   ;;  %s26_s19 = sadd.s32 1, %s778_s14 }
   0x7   : > { %s23_s20 = ssub.s32 %s782_s15, %s842_s18  ;;  %p33_p0 = scmp.ne.s32.totalorder %s778_s14, %s774_s13 }
   0x8   : > { %p24_p1 = scmp.eq.s32.totalorder %s23_s20, 0  ;;  %p34_p2 = scmp.eq.s32.totalorder %s782_s15, 0 }
   0x9   : > { %p39_p3 = scmp.ne.s32.totalorder %s774_s13, %s770_s12  ;;  %p40_p4 = scmp.eq.s32.totalorder %s838_s16, 0 }
   0xa   : > { %s854_s21 = scalar_select %p24_p1, %s778_s14, %s26_s19  }
   0xb   : > { %p856_p5 = por %p34_p2, %p33_p0  ;;  %p860_p6 = por %p40_p4, %p39_p3 }
   0xc   : > { %p105_p7 = scmp.eq.s32.totalorder %s838_s16, 1  ;;  %p111_p8 = scmp.eq.s32.totalorder %s607_s17, 1 }
   0xd   : > { %s1049_s23 = scalar_select %p860_p6, 1, 0 }
   0xe   : > { %p638_p10 = scmp.lt.s32.totalorder %s782_s15, 2  ;;  %p867_p11 = por %p105_p7, %p33_p0 }
   0xf   : > { %p871_p12 = por %p111_p8, %p39_p3  ;;  %s137_s26 = sand.u32 1, %s778_s14  }
  0x10   : > { %s1050_s24 = scalar_select %p867_p11, 1, 0 }
  0x11   : > { %s1051_s25 = scalar_select %p871_p12, 1, 0 }
  0x12   : > { %s624_s27 = sshll.u32 %s782_s15, 7  ;;  %s610_s28 = sshll.u32 %s137_s26, 3 }
  0x13   : > { %s880_s4 = scalar_lea.hbm %s1042_s0, %s624_s27  ;;  %s141_s5 = scalar_lea.vmem [#allocation4], %s610_s28 }
  0x14   : > { %s149_s6 = sshll.u32 %s141_s5, 4  ;;  %p884_p13 = pnand %p638_p10, %p856_p5  ;;  %s888_s6 = int_to_ptr.vmem [resolvable:$true] %s149_s6 }
  0x15   : > { %s138_s8 = scalar_lea.sflag [#allocation5], %s137_s26  ;;  %s690_s9 = scalar_lea.hbm %s880_s4, 128 }
  0x16   : > { %p691_p2 = scmp.ne.s32.totalorder %s880_s4, %s690_s9  ;;  %p692_p3 = pneg %p884_p13 }
  0x17   : > { %s695_s17 = scalar_lea.hbm %s1042_s0, 256  ;;  %p696_p5 = scmp.lt.s32.totalorder %s880_s4, %s1042_s0 }
  0x18   : > { %p693_p4 = pnand %p692_p3, %p691_p2  ;;  %p697_p8 = scmp.lt.s32.totalorder %s695_s17, %s690_s9 }
  0x1a   : > { %p694_p7 = pneg %p693_p4  ;;  %p698_p10 = por %p697_p8, %p696_p5 }
  0x1c   : > { %p699_p9 = pnand %p698_p10, %p694_p7 }
  0x1e   : > { %702 = shalt.err (!%p699_p9)
}
  0x1f   : > { %s703_s22 = scalar_lea.vmem %s888_s6, 128  ;;  %s784_s26 = smov [#allocation4]  }
  0x20   : > { %p704_p0 = scmp.ne.s32.totalorder %s888_s6, %s703_s22  ;;  %s708_s27 = sshll.u32 %s784_s26, 4  ;;  %s709_s27 = int_to_ptr.vmem [resolvable:$false] %s708_s27 }
  0x21   : > { %s710_s28 = scalar_lea.vmem %s709_s27, 256  ;;  %p711_p4 = scmp.lt.s32.totalorder %s888_s6, %s709_s27 }
  0x22   : > { %p706_p1 = pnand %p704_p0, %p692_p3  ;;  %p712_p12 = scmp.lt.s32.totalorder %s710_s28, %s703_s22 }
  0x24   : > { %p707_p2 = pneg %p706_p1  ;;  %p713_p11 = por %p712_p12, %p711_p4 }
  0x26   : > { %p714_p6 = pnand %p713_p11, %p707_p2 }
  0x28   : > { %717 = shalt.err (!%p714_p6)
}
  0x29   : > { %633 = dma.hbm_to_vmem [thread:$0]  (!%p884_p13), %s880_s4, 128, %s888_s6, %s138_s8  }
  0x2a   : > { %p1053_p9 = scmp.lt.s32.totalorder %s782_s15, 3  ;;  %p1054_p7 = scmp.ge.s32.totalorder %s782_s15, 1 }
  0x2c   : > { %p155_p0 = pnand %p1054_p7, %p1053_p9 }
  0x2d   : > { %s915_s29 = sand.u32 (!%p155_p0), 1, %s774_s13   ;;  %p1055_p6 = scmp.ne.s32.totalorder (!%p155_p0), %s1049_s23, 0 }
  0x2e   : > { %158 = sbr.rel (%p155_p0) target bundleno = 564 (0x234), region = 32  ;;  %s614_s30 = sshll.u32 (!%p155_p0), %s915_s29, 3 }
  0x2f   : > { %s161_s5 = scalar_lea.sflag (!%p155_p0), [#allocation5], %s915_s29  ;;  %s164_s7 = scalar_lea.vmem (!%p155_p0), [#allocation4], %s614_s30 }
  0x33   : > { %761 = dma.done.wait (%p1055_p6), %s161_s5, 128  }
  0x34   : > { %763 = vsyncadd (%p1055_p6), %s161_s5, 4294967168  ;;  %vm189_vm0 = vcmask 273408   ;;  %v785_v0 = vmov 0.0   ;;  %v925_v1 = vld [vmem:[%s164_s7] sm:$0xff]  ;;  %s786_s4 = smov 17   ;;  %v205_v2 = vlaneseq  ;;  %vm199_vm1 = vcmask 1043592  }
  0x35   : > { %188 = vst [vmem:[#allocation2] sm:$0xff] %v785_v0  ;;  %190 = vst.msk [vmem:[#allocation2 + $0x8] sm:$0xf] %vm189_vm0, %v785_v0  ;;  %504 = vmatprep.mubr.f32.mxu0 %v785_v0  ;;  %192 = vrot.lane.b32.xlu0 %v925_v1, %s786_s4  ;;  %vm200_vm2 = vcmask 1047556   ;;  %vm195_vm3 = vcmask 138240   ;;  %vm203_vm4 = vcmask 134144  }
  0x36   : > { %v928_v3 = vand.u32 127, %v205_v2  ;;  %vm201_vm5 = vmor %vm200_vm2, %vm199_vm1  ;;  %s787_s23 = smov 94   ;;  %s788_s6 = smov 110   ;;  %v795_v25 = vmov 0   ;;  %v423_v26 = vld [vmem:[%s1044_s2] sm:$0xf] }
  0x37   : > { %s789_s8 = smov 95   ;;  %s790_s9 = smov 96   ;;  %683 = vset.pattern.permute.xlu1 %v795_v25  ;;  %684 = vset.pattern.permute.xlu0 %v795_v25  ;;  %vm403_vm8 = vcmask 769024   ;;  %vm338_vm10 = vcmask 900096   ;;  %vm364_vm12 = vcmask 785408   ;;  %vm433_vm13 = vcmask 1043456  }
  0x38   : > { %v931_v7 = vadd.s32 128, %v928_v3  ;;  %v212_v9 = vand.u32 15, %v928_v3  ;;  %s791_s10 = smov 111   ;;  %s792_s11 = smov 112   ;;  %vm294_vm14 = vcmask 916480   ;;  %vm385_vm15 = vcmask 777216  }
  0x39   : > { %s793_s17 = smov 127   ;;  %s794_s19 = smov 126   ;;  %vm320_vm0 = vcmask 908288   ;;  %vm274_vm1 = vcmask 1031168   ;;  %vm256_vm2 = vcmask 1039360  }
  0x3a   : > { %v219_v8 = vand.u32 15, %v931_v7  ;;  %vm944_vm7 = vcmp.ge.s32.totalorder %v212_v9, 1  ;;  %vm970_vm11 = vcmp.le.s32.totalorder %v212_v9, 14  ;;  %s625_s28 = sshll.u32 %s838_s16, 7  ;;  %s186_s5 = scalar_lea.vmem [#allocation7], %s614_s30 }
  0x3b   : > { %s537_s7 = sshll.u32 %s186_s5, 4  ;;  %p1064_p12 = scmp.ne.s32.totalorder %s1050_s24, 0  ;;  %s538_s7 = int_to_ptr.vmem [resolvable:$true] %s537_s7 }
  0x3c   : > { %vm938_vm6 = vcmp.ge.s32.totalorder %v219_v8, 1  ;;  %vm961_vm9 = vcmp.le.s32.totalorder %v219_v8, 14 }
  0xa7   : > { %v193_v4 = vpop.permute.xlu0 %192 }
  0xa8   : > { %v194_v5 = vrot.slane %v193_v4, 4 }
  0xaa   : > { %v196_v6 = vsel %vm195_vm3, %v194_v5, %v193_v4  ;;  %204 = vst.msk [vmem:[#allocation2 + $0x8] sm:$0xf] %vm203_vm4, %v194_v5  ;;  %vm429_vm3 = vcmask 293888  }
  0xab   : > { %202 = vst.msk [vmem:[#allocation2] sm:$0xff] %vm201_vm5, %v196_v6 }
  0xb1   : > { %v393_v10 = vld [vmem:[#allocation2 + $0x8] sm:$0xf] }
  0xb2   : > { %401 = vrot.lane.b32.xlu1 %v393_v10, %s787_s23  ;;  %v327_v11 = vld [vmem:[#allocation2] sm:$0xff]  ;;  %v328_v15 = vld [vmem:[#allocation2 + $0x8] sm:$0xf] }
  0xb3   : > { %332 = vrot.lane.b32.xlu0 %v327_v11, %s788_s6  ;;  %v331_v14 = vcombine.high %v327_v11, %v327_v11  ;;  %v240_v17 = vsel %vm944_vm7, %v327_v11, 0.0  ;;  %v354_v18 = vld [vmem:[#allocation2 + $0x8] sm:$0xf]  ;;  %v377_v22 = vcombine.low %v327_v11, %v327_v11 }
  0xb4   : > { %242 = vst [vmem:[#allocation3 + $0x30] sm:$0xf] %v240_v17  ;;  %v284_v19 = vld [vmem:[#allocation2 + $0x8] sm:$0xf] }
  0xb5   : > { %v241_v16 = vsel %vm938_vm6, %v331_v14, 0.0  ;;  %v310_v20 = vld [vmem:[#allocation2 + $0x8] sm:$0xf] }
  0xb6   : > { %336 = vrot.lane.b32.xlu1 %v328_v15, %s788_s6  ;;  %243 = vst [vmem:[#allocation3] sm:$0xf] %v241_v16  ;;  %v264_v21 = vld [vmem:[#allocation2 + $0x8] sm:$0xf] }
  0xb7   : > { %381 = vrot.lane.b32.xlu0 %v327_v11, %s789_s8  ;;  %v688_v23 = vld [vmem:[#allocation2 + $0x8] ss:$0 sps:$4 sm:$0xff]  }
  0xb8   : > { %v689_v24 = vld [vmem:[#allocation2 + $0x8] ss:$0 sps:$4 sm:$0xff]  }
  0xba   : > { %362 = vrot.lane.b32.xlu1 %v354_v18, %s790_s9 }
  0xbb   : > { %314 = vrot.lane.b32.xlu0 %v327_v11, %s791_s10 }
  0xbe   : > { %292 = vrot.lane.b32.xlu1 %v284_v19, %s792_s11 }
  0xbf   : > { %252 = vrot.lane.b32.xlu0 %v327_v11, %s793_s17 }
  0xc2   : > { %318 = vrot.lane.b32.xlu1 %v310_v20, %s791_s10 }
  0xc3   : > { %399 = vrot.lane.b32.xlu0 %v331_v14, %s787_s23 }
  0xc6   : > { %272 = vrot.lane.b32.xlu1 %v264_v21, %s794_s19 }
  0xc7   : > { %334 = vrot.lane.b32.xlu0 %v331_v14, %s788_s6  ;;  %s535_s6 = scalar_lea.hbm %s1045_s3, %s625_s28 }
  0xca   : > { %397 = vrot.lane.b32.xlu1 %v327_v11, %s787_s23 }
  0xcb   : > { %360 = vrot.lane.b32.xlu0 %v331_v14, %s790_s9 }
  0xce   : > { %358 = vrot.lane.b32.xlu1 %v327_v11, %s790_s9  ;;  %s718_s9 = scalar_lea.vmem %s538_s7, 128 }
  0xcf   : > { %290 = vrot.lane.b32.xlu0 %v331_v14, %s792_s11  ;;  %p719_p11 = scmp.ne.s32.totalorder %s538_s7, %s718_s9 }
  0xd1   : > { %p720_p13 = pnand %p719_p11, %p1064_p12 }
  0xd2   : > { %288 = vrot.lane.b32.xlu1 %v327_v11, %s792_s11 }
  0xd3   : > { %379 = vrot.lane.b32.xlu0 %v377_v22, %s789_s8  ;;  %p721_p1 = pneg %p720_p13 }
  0xd6   : > { %383 = vrot.lane.b32.xlu1 %v688_v23, %s789_s8  ;;  %s523_s8 = scalar_lea.sflag [#allocation6], %s915_s29 }
  0xd7   : > { %316 = vrot.lane.b32.xlu0 %v331_v14, %s791_s10  ;;  %s796_s10 = smov [#allocation7]  }
  0xd8   : > { %s722_s16 = sshll.u32 %s796_s10, 4  ;;  %s723_s16 = int_to_ptr.vmem [resolvable:$false] %s722_s16 }
  0xd9   : > { %s724_s30 = scalar_lea.vmem %s723_s16, 256  ;;  %p725_p3 = scmp.lt.s32.totalorder %s538_s7, %s723_s16 }
  0xda   : > { %268 = vrot.lane.b32.xlu1 %v327_v11, %s794_s19  ;;  %p726_p5 = scmp.lt.s32.totalorder %s724_s30, %s718_s9 }
  0xdb   : > { %270 = vrot.lane.b32.xlu0 %v331_v14, %s794_s19 }
  0xdc   : > { %p727_p8 = por %p726_p5, %p725_p3 }
  0xde   : > { %254 = vrot.lane.b32.xlu1 %v689_v24, %s793_s17  ;;  %p728_p10 = pnand %p727_p8, %p721_p1 }
  0xdf   : > { %250 = vrot.lane.b32.xlu0 %v377_v22, %s793_s17 }
  0xe2   : > { %426 = vperm.xlu1 %683, %v423_v26  }
 0x124   : > { %v402_v27 = vpop.permute.xlu1 %401 }
 0x125   : > { %v333_v28 = vpop.permute.xlu0 %332 }
 0x128   : > { %v337_v29 = vpop.permute.xlu1 %336 }
 0x129   : > { %v382_v30 = vpop.permute.xlu0 %381 }
 0x12c   : > { %v363_v31 = vpop.permute.xlu1 %362 }
 0x12d   : > { %v315_v32 = vpop.permute.xlu0 %314 }
 0x130   : > { %v293_v33 = vpop.permute.xlu1 %292 }
 0x131   : > { %v957_v34 = vpop.permute.xlu0 %252 }
 0x134   : > { %v319_v35 = vpop.permute.xlu1 %318 }
 0x135   : > { %v400_v37 = vpop.permute.xlu0 %399 }
 0x136   : > { %v405_v38 = vsel %vm403_vm8, %v400_v37, %v402_v27 }
 0x137   : > { %v409_v39 = vsel %vm961_vm9, %v405_v38, 0.0 }
 0x138   : > { %411 = vst [vmem:[#allocation3 + $0x38] sm:$0xf] %v409_v39  ;;  %v273_v40 = vpop.permute.xlu1 %272 }
 0x139   : > { %v335_v42 = vpop.permute.xlu0 %334 }
 0x13a   : > { %v339_v43 = vsel %vm338_vm10, %v333_v28, %v335_v42  ;;  %v340_v44 = vsel %vm338_vm10, %v335_v42, %v337_v29  ;;  %v412_v29 = vld [vmem:[%s1043_s1] sm:$0xf] }
 0x13b   : > { %v343_v45 = vsel %vm970_vm11, %v339_v43, 0.0  ;;  %v344_v46 = vsel %vm961_vm9, %v340_v44, 0.0 }
 0x13c   : > { %v347_v47 = vrot.slane %v343_v45, 4  ;;  %v348_v48 = vrot.slane %v344_v46, 4  ;;  %v398_v49 = vpop.permute.xlu1 %397 }
 0x13d   : > { %v404_v50 = vsel %vm403_vm8, %v398_v49, %v400_v37  ;;  %v361_v51 = vpop.permute.xlu0 %360 }
 0x13e   : > { %351 = vst [vmem:[#allocation3 + $0x48] sm:$0xf0] %v347_v47  ;;  %352 = vst [vmem:[#allocation3 + $0x28] sm:$0xf0] %v348_v48  ;;  %v408_v52 = vsel %vm970_vm11, %v404_v50, 0.0  ;;  %v366_v53 = vsel %vm364_vm12, %v361_v51, %v363_v31 }
 0x13f   : > { %410 = vst [vmem:[#allocation3 + $0x40] sm:$0xf] %v408_v52  ;;  %v370_v54 = vsel %vm938_vm6, %v366_v53, 0.0  ;;  %v422_v55 = vld [vmem:[#allocation3 + $0x38] sm:$0xf] }
 0x140   : > { %372 = vst [vmem:[#allocation3 + $0x20] sm:$0xf] %v370_v54  ;;  %v359_v56 = vpop.permute.xlu1 %358  ;;  %616 = vmatprep.subr.msk.mxu0 %vm433_vm13, %v422_v55 }
 0x141   : > { %v365_v57 = vsel %vm364_vm12, %v359_v56, %v361_v51  ;;  %v291_v58 = vpop.permute.xlu0 %290 }
 0x142   : > { %v369_v59 = vsel %vm944_vm7, %v365_v57, 0.0  ;;  %v296_v60 = vsel %vm294_vm14, %v291_v58, %v293_v33  ;;  %v511_v33 = vcombine.high %v925_v1, %v925_v1 }
 0x143   : > { %371 = vst [vmem:[#allocation3 + $0x8] sm:$0xf] %v369_v59  ;;  %v300_v61 = vsel %vm938_vm6, %v296_v60, 0.0 }
 0x144   : > { %v304_v62 = vrot.slane %v300_v61, 4  ;;  %v289_v63 = vpop.permute.xlu1 %288 }
 0x145   : > { %v295_v0 = vsel %vm294_vm14, %v289_v63, %v291_v58  ;;  %v380_v2 = vpop.permute.xlu0 %379 }
 0x146   : > { %308 = vst [vmem:[#allocation3 + $0x10] sm:$0xf0] %v304_v62  ;;  %v299_v3 = vsel %vm944_vm7, %v295_v0, 0.0  ;;  %v386_v4 = vsel %vm385_vm15, %v380_v2, %v382_v30  ;;  %v421_v5 = vld [vmem:[#allocation3 + $0x40] sm:$0xf] }
 0x147   : > { %v303_v6 = vrot.slane %v299_v3, 4  ;;  %390 = vst [vmem:[#allocation3 + $0x8] sm:$0xf0] %v386_v4  ;;  %617 = vmatpush1.msk.msra.mxu0 %vm433_vm13, %v421_v5 }
 0x148   : > { %v384_v7 = vpop.permute.xlu1 %383 }
 0x149   : > { %307 = vst [vmem:[#allocation3 + $0x18] sm:$0xf0] %v303_v6  ;;  %v387_v8 = vsel %vm385_vm15, %v382_v30, %v384_v7  ;;  %v317_v9 = vpop.permute.xlu0 %316 }
 0x14a   : > { %391 = vst [vmem:[#allocation3 + $0x20] sm:$0xf0] %v387_v8  ;;  %v321_v10 = vsel %vm320_vm0, %v315_v32, %v317_v9  ;;  %v322_v11 = vsel %vm320_vm0, %v317_v9, %v319_v35 }
 0x14b   : > { %325 = vst [vmem:[#allocation3 + $0x48] sm:$0xf] %v321_v10  ;;  %326 = vst [vmem:[#allocation3 + $0x28] sm:$0xf] %v322_v11 }
 0x14c   : > { %v269_v12 = vpop.permute.xlu1 %268 }
 0x14d   : > { %v271_v13 = vpop.permute.xlu0 %270 }
 0x14e   : > { %v275_v14 = vsel %vm274_vm1, %v269_v12, %v271_v13  ;;  %v276_v15 = vsel %vm274_vm1, %v271_v13, %v273_v40  ;;  %v419_v23 = vld [vmem:[#allocation3 + $0x8] sm:$0xff] }
 0x14f   : > { %v279_v16 = vsel %vm970_vm11, %v275_v14, 0.0  ;;  %v280_v17 = vsel %vm961_vm9, %v276_v15, 0.0 }
 0x150   : > { %281 = vst [vmem:[#allocation3 + $0x18] sm:$0xf] %v279_v16  ;;  %282 = vst [vmem:[#allocation3 + $0x10] sm:$0xf] %v280_v17  ;;  %v255_v18 = vpop.permute.xlu1 %254 }
 0x151   : > { %v258_v19 = vsel %vm256_vm2, %v957_v34, %v255_v18  ;;  %v251_v20 = vpop.permute.xlu0 %250  ;;  %v420_v21 = vld [vmem:[#allocation3 + $0x20] sm:$0xff] }
 0x152   : > { %262 = vst [vmem:[#allocation3] sm:$0xf0] %v258_v19  ;;  %v257_v22 = vsel %vm256_vm2, %v251_v20, %v957_v34  ;;  %464 = vmatprep.subr.mxu0 %v420_v21  ;;  %v418_v24 = vld [vmem:[#allocation3 + $0x28] sm:$0xff] }
 0x153   : > { %261 = vst [vmem:[#allocation3 + $0x30] sm:$0xf0] %v257_v22  ;;  %465 = vmatpush1.msra.mxu0 %v419_v23  ;;  %v417_v25 = vld [vmem:[#allocation3 + $0x48] sm:$0xff] }
 0x154   : > { %466 = vmatprep.subr.mxu0 %v418_v24 }
 0x155   : > { %467 = vmatpush1.msra.mxu0 %v417_v25 }
 0x157   : > { %v416_v26 = vld [vmem:[#allocation3 + $0x10] sm:$0xff]  ;;  %v415_v27 = vld [vmem:[#allocation3 + $0x18] sm:$0xff] }
 0x158   : > { %468 = vmatprep.subr.mxu0 %v416_v26 }
 0x159   : > { %469 = vmatpush1.msra.mxu0 %v415_v27  ;;  %v414_v28 = vld [vmem:[#allocation3] sm:$0xff] }
 0x15a   : > { %470 = vmatprep.subr.mxu0 %v414_v28  ;;  %v413_v30 = vld [vmem:[#allocation3 + $0x30] sm:$0xff] }
 0x15b   : > { %471 = vmatpush1.msra.mxu0 %v413_v30 }
 0x15c   : > { %618 = vmatmul.mubr.msk.f32.vlgmr.msra.gmra.mxu0 %vm429_vm3, %v412_v29 }
 0x15d   : > { %v427_v31 = vpop.permute.xlu1 %426 }
 0x21c   : > { %v506_v32 = vpop.f32.mrf.mxu0 }
 0x21d   : > { %v507_v34 = vadd.f32 %v506_v32, %v427_v31 }
 0x21e   : > { %v508_v35 = vpop.f32.mrf.mxu0 }
 0x21f   : > { %v513_v36 = vadd.f32 %v507_v34, %v925_v1  ;;  %v509_v37 = vadd.f32 %v508_v35, %v427_v31 }
 0x221   : > { %v514_v38 = vadd.f32 %v511_v33, %v509_v37  ;;  %v515_v39 = vmax.f32 %v513_v36, 0.0 }
 0x223   : > { %v516_v40 = vmax.f32 %v514_v38, 0.0 }
 0x225   : > { %v519_v41 = vcombine.low %v515_v39, %v516_v40 }
 0x227   : > { %521 = vst [vmem:[%s186_s5] sm:$0xff] %v519_v41 }
 0x228   : > { %731 = shalt.err (!%p728_p10)
}
 0x229   : > { %s732_s11 = scalar_lea.hbm %s535_s6, 128  ;;  %s736_s19 = scalar_lea.hbm %s1045_s3, 256 }
 0x22a   : > { %p733_p2 = scmp.ne.s32.totalorder %s535_s6, %s732_s11  ;;  %p737_p7 = scmp.lt.s32.totalorder %s535_s6, %s1045_s3 }
 0x22b   : > { %p738_p0 = scmp.lt.s32.totalorder %s736_s19, %s732_s11 }
 0x22c   : > { %p734_p4 = pnand %p733_p2, %p1064_p12 }
 0x22d   : > { %p739_p6 = por %p738_p0, %p737_p7 }
 0x22e   : > { %p735_p9 = pneg %p734_p4 }
 0x230   : > { %p740_p11 = pnand %p739_p6, %p735_p9 }
 0x232   : > { %743 = shalt.err (!%p740_p11)
}
 0x233   : > { %628 = dma.vmem_to_hbm [thread:$0]  (%p1064_p12), %s538_s7, 128, %s535_s6, %s523_s8  }
 0x234 PF: > { %s549_s26 = sand.u32 1, %s770_s12   ;;  %p1065_p13 = scmp.ne.s32.totalorder %s1051_s25, 0 }
 0x235   : > { %p1066_p1 = scmp.ge.s32.totalorder %s782_s15, 2  ;;  %s550_s27 = scalar_lea.sflag [#allocation6], %s549_s26 }
 0x237   : > { %p635_p3 = pnand %p1066_p1, %p1065_p13 }
 0x239   : > { %p636_p5 = pneg %p635_p3 }
 0x23b   : > { %765 = dma.done.wait (%p636_p5), %s550_s27, 128  }
 0x23c   : > { %767 = vsyncadd (%p636_p5), %s550_s27, 4294967168  ;;  %p16_p8 = scmp.ge.s32.totalorder %s842_s18, 4   ;;  %s1067_s12 = smov %s774_s13 }
 0x23d   : > { %s1068_s13 = smov %s778_s14  ;;  %s1069_s14 = smov %s854_s21 }
 0x23e   : > { %s1070_s15 = smov %s842_s18  ;;  %18 = sbr.rel (!%p16_p8) target bundleno = 5 (0x5), region = 77 }
 0x243   :  { %555 = vsyncpa [#allocation5], 1 }
 0x244   :  { %557 = vsyncpa [#allocation5 + $0x1], 1 }
 0x245   :  { %558 = vsyncpa [#allocation6], 1 }
 0x246   :  { %560 = vsyncpa [#allocation6 + $0x1], 1 }

</bundles_post_ra>
